<compile_context>
chip_gen: v5e
topology: v5e:2x2
jax: 0.10.0
libtpu: 0.0.40
codegen_flags: <defaults>
</compile_context>

<pallas_src>
import math

import jax
import jax.numpy as jnp
from jax.experimental import pallas as pl
from jax.experimental.pallas import tpu as pltpu

_INV_SQRT2 = 1.0 / math.sqrt(2.0)


# ----------------------------------------------------------------------------
# small helpers
# ----------------------------------------------------------------------------
def _round_up(a, b):
    return (a + b - 1) // b * b


def _cdiv(a, b):
    return (a + b - 1) // b


def _tpu_flavor():
    try:
        kind = jax.devices()[0].device_kind.lower()
    except Exception:
        return "unknown"
    if "v7" in kind:
        return "v7x"
    if "v6" in kind:
        return "v6e"
    if "v5e" in kind or "v5 lite" in kind or "v5lite" in kind:
        return "v5e"
    return "unknown"


def _vmem_capacity_bytes(flavor):
    try:
        cap = getattr(pltpu.get_tpu_info(), "vmem_capacity_bytes", None)
        if cap:
            return int(cap)
    except Exception:
        pass
    if flavor == "v7x":
        return 64 * 1024 * 1024
    if flavor in ("v5e", "v6e"):
        return 128 * 1024 * 1024
    return 64 * 1024 * 1024  # conservative fallback


def _plan_bytes(tm, tk, d, act_bytes, w_bytes, n_k, single_buf_w):
    """Rough per-step VMEM footprint of the chosen tiling."""
    w_bufs = 1 if single_buf_w else 2
    est = 2 * tm * d * act_bytes            # x tile (double buffered)
    est += 2 * tm * d * act_bytes           # out tile (double buffered)
    est += tm * tk * 4                      # f32 hidden intermediate
    if n_k > 1:
        est += tm * d * 4                   # f32 accumulator scratch
    est += w_bufs * 2 * tk * d * w_bytes    # W1^T (D, tk) + W2^T (tk, D)
    est += 4 * (tk + d) * 4                 # biases (negligible)
    return est


def _spec(shape, index_map, single_buffer=False):
    if single_buffer:
        # grid-invariant operand: one resident copy, no double buffering
        return pl.BlockSpec(shape, index_map, pipeline_mode=pl.Buffered(1))
    return pl.BlockSpec(shape, index_map)


# ----------------------------------------------------------------------------
# kernels
# ----------------------------------------------------------------------------
def _ffn_kernel_resident(x_ref, w1t_ref, b1_ref, w2t_ref, b2_ref, o_ref):
    """Single hidden tile (n_k == 1): both weight matrices fully resident."""
    # x_ref: (tm, D); w1t_ref: (D, D) (in,out); b1_ref: (1, D) f32;
    # w2t_ref: (D, D) (in,out); b2_ref: (1, D) f32; o_ref: (tm, D).
    x = x_ref[...].astype(w1t_ref.dtype)

    h = jnp.dot(x, w1t_ref[...], preferred_element_type=jnp.float32)
    h = h + b1_ref[...]
    # Exact (erf) GELU -- matches PyTorch nn.GELU() default. NB: lax.erf is a
    # VALU polynomial (not an EUP transcendental); it hides under the MXU here.
    h = 0.5 * h * (1.0 + jax.lax.erf(h * _INV_SQRT2))

    y = jnp.dot(h.astype(w2t_ref.dtype), w2t_ref[...],
                preferred_element_type=jnp.float32)
    o_ref[...] = (y + b2_ref[...]).astype(o_ref.dtype)


def _ffn_kernel_split(x_ref, w1t_ref, b1_ref, w2t_ref, b2_ref, o_ref, acc_ref):
    """Hidden dim tiled (n_k > 1): f32 accumulator resident across k."""
    # x_ref: (tm, D); w1t_ref: (D, tk); b1_ref: (1, tk) f32; w2t_ref: (tk, D);
    # b2_ref: (1, D) f32; o_ref: (tm, D); acc_ref: (tm, D) f32 scratch.
    k = pl.program_id(1)

    @pl.when(k == 0)
    def _init():
        # seed the accumulator with the second bias (added exactly once)
        acc_ref[...] = jnp.broadcast_to(b2_ref[...], acc_ref.shape).astype(jnp.float32)

    x = x_ref[...].astype(w1t_ref.dtype)

    h = jnp.dot(x, w1t_ref[...], preferred_element_type=jnp.float32)  # (tm, tk)
    h = h + b1_ref[...]
    h = 0.5 * h * (1.0 + jax.lax.erf(h * _INV_SQRT2))                 # exact GELU

    acc_ref[...] += jnp.dot(h.astype(w2t_ref.dtype), w2t_ref[...],
                            preferred_element_type=jnp.float32)

    @pl.when(k == pl.num_programs(1) - 1)
    def _finalize():
        o_ref[...] = acc_ref[...].astype(o_ref.dtype)


# ----------------------------------------------------------------------------
# wrapper
# ----------------------------------------------------------------------------
def feed_forward_block(x, w1, b1, w2, b2, *, tm=None, tk=None,
                       compute_dtype=jnp.bfloat16):
    """x: (B, S, D). w1, w2: (D, D) in PyTorch (out, in) layout. b1, b2: (D,).

    compute_dtype: matmul input dtype (default bf16, MXU-native); accumulation,
    bias-add and GELU are always f32; output keeps x's original dtype.
    """
    B, S, D = x.shape
    out_dtype = x.dtype

    # One-time weight prep: cast + transpose to (in, out) so both dot_generals
    # contract LHS-last x RHS-first (no per-tile transpose inside the kernel).
    # Under jit with constant weights this folds; otherwise hoist it out of the
    # per-call path and reuse the prepared weights.
    if compute_dtype is not None:
        x = x.astype(compute_dtype)
        w1 = w1.astype(compute_dtype)
        w2 = w2.astype(compute_dtype)
    w1t = w1.T  # (in, out)
    w2t = w2.T  # (in, out)

    flavor = _tpu_flavor()
    budget = int(_vmem_capacity_bytes(flavor) * 0.72)   # headroom for Mosaic scratch

    act_bytes = jnp.dtype(x.dtype).itemsize
    w_bytes = jnp.dtype(w1t.dtype).itemsize
    row_align = 8 if act_bytes >= 4 else (16 if act_bytes == 2 else 32)

    M = B * S

    # --- hidden-dim tile: keep weights fully resident whenever they fit ------
    if tk is None:
        resident_bytes = 2 * D * D * w_bytes
        if resident_bytes <= int(0.45 * budget) or D % 128 != 0:
            tk = D                                      # n_k == 1: fully resident
        else:
            # v6e/v7x prefer 256-multiples (256-wide MXU); v5e is fine with 128.
            cands = (512, 256, 384, 128) if flavor in ("v6e", "v7x") else (512, 384, 256, 128)
            tk = D
            for c in cands:
                if D % c == 0:
                    tk = c
                    break
    assert D % tk == 0, "hidden tile must divide n_dim"
    n_k = D // tk

    # --- row tile: generation-aware (weight-restream roofline when n_k > 1) --
    if tm is None:
        if n_k == 1:
            tm = 512
        elif flavor == "v6e":
            tm = 768 if act_bytes <= 2 else 1280
        elif flavor == "v7x":
            tm = 512 if act_bytes <= 2 else 256
        elif flavor == "v5e":
            tm = 512
        else:
            tm = 512
    tm_eff = min(_round_up(tm, row_align), _round_up(M, row_align))

    single_buf_w = (n_k == 1) and (D * D * w_bytes >= (1 << 20))

    # --- VMEM fit: shrink tm first, then tk --------------------------------
    tm_floor = min(_round_up(M, row_align), 128)
    tm_floor = max(tm_floor, row_align)
    while _plan_bytes(tm_eff, tk, D, act_bytes, w_bytes, n_k, single_buf_w) > budget:
        new_tm = max(tm_floor, _round_up(max(tm_eff // 2, row_align), row_align))
        if new_tm < tm_eff:
            tm_eff = new_tm
            continue
        if tk > 128 and (tk // 2) % 128 == 0 and D % (tk // 2) == 0:
            tk //= 2
            n_k = D // tk
            single_buf_w = (n_k == 1) and (D * D * w_bytes >= (1 << 20))
            continue
        break  # best effort; vmem_limit below still leaves compiler headroom

    # --- v7x: make sure both TensorCores get row tiles ----------------------
    if flavor == "v7x" and _cdiv(M, tm_eff) < 2 and M > row_align:
        tm_eff = max(row_align, _round_up(_cdiv(M, 2), row_align))

    grid_rows = _cdiv(M, tm_eff)   # ragged last tile handled by Pallas (no pad)

    est = _plan_bytes(tm_eff, tk, D, act_bytes, w_bytes, n_k, single_buf_w)
    vmem_limit = int(min(max(est * 3 // 2 + (2 << 20), 32 << 20), max(budget, 32 << 20)))

    x2d = x.reshape(M, D)
    b1_2d = b1.reshape(1, D).astype(jnp.float32)
    b2_2d = b2.reshape(1, D).astype(jnp.float32)

    if n_k == 1:
        out = pl.pallas_call(
            _ffn_kernel_resident,
            out_shape=jax.ShapeDtypeStruct((M, D), out_dtype),
            grid_spec=pltpu.PrefetchScalarGridSpec(
                num_scalar_prefetch=0,
                grid=(grid_rows,),
                in_specs=[
                    pl.BlockSpec((tm_eff, D), lambda i: (i, 0)),        # x row tile
                    _spec((D, D), lambda i: (0, 0), single_buf_w),      # W1^T
                    _spec((1, D), lambda i: (0, 0), single_buf_w),      # b1
                    _spec((D, D), lambda i: (0, 0), single_buf_w),      # W2^T
                    _spec((1, D), lambda i: (0, 0), single_buf_w),      # b2
                ],
                out_specs=pl.BlockSpec((tm_eff, D), lambda i: (i, 0)),
            ),
            compiler_params=pltpu.CompilerParams(
                dimension_semantics=("parallel",),
                vmem_limit_bytes=vmem_limit,
            ),
        )(x2d, w1t, b1_2d, w2t, b2_2d)
    else:
        out = pl.pallas_call(
            _ffn_kernel_split,
            out_shape=jax.ShapeDtypeStruct((M, D), out_dtype),
            grid_spec=pltpu.PrefetchScalarGridSpec(
                num_scalar_prefetch=0,
                grid=(grid_rows, n_k),
                in_specs=[
                    pl.BlockSpec((tm_eff, D), lambda i, k: (i, 0)),     # x row tile
                    pl.BlockSpec((D, tk), lambda i, k: (0, k)),         # W1^T[:, k_tile]
                    pl.BlockSpec((1, tk), lambda i, k: (0, k)),         # b1[k_tile]
                    pl.BlockSpec((tk, D), lambda i, k: (k, 0)),         # W2^T[k_tile, :]
                    pl.BlockSpec((1, D), lambda i, k: (0, 0)),          # b2
                ],
                out_specs=pl.BlockSpec((tm_eff, D), lambda i, k: (i, 0)),
                scratch_shapes=[pltpu.VMEM((tm_eff, D), jnp.float32)],
            ),
            compiler_params=pltpu.CompilerParams(
                dimension_semantics=("parallel", "arbitrary"),
                vmem_limit_bytes=vmem_limit,
            ),
        )(x2d, w1t, b1_2d, w2t, b2_2d)

    return out.reshape(B, S, D)


# ----------------------------------------------------------------------------
# reference + demo
# ----------------------------------------------------------------------------
def _reference(x, w1, b1, w2, b2):
    p = jax.lax.Precision.HIGHEST
    h = jnp.einsum("bsd,od->bso", x, w1, precision=p) + b1
    h = 0.5 * h * (1.0 + jax.lax.erf(h / math.sqrt(2.0)))
    y = jnp.einsum("bsd,od->bso", h, w2, precision=p) + b2
    return y


def _make_params(key, D):
    kw1, kb1, kw2, kb2 = jax.random.split(key, 4)
    bound = 1.0 / math.sqrt(D)
    w1 = jax.random.uniform(kw1, (D, D), jnp.float32, -bound, bound)  # (out, in)
    b1 = jax.random.uniform(kb1, (D,), jnp.float32, -bound, bound)
    w2 = jax.random.uniform(kw2, (D, D), jnp.float32, -bound, bound)
    b2 = jax.random.uniform(kb2, (D,), jnp.float32, -bound, bound)
    return w1, b1, w2, b2


if __name__ == "__main__":
    key = jax.random.PRNGKey(0)
    k_small, k_x_small, k_big, k_x_big = jax.random.split(key, 4)

    # --- small shape from the module spec: batch=2, seq=8, n_dim=32 ---------
    B, S, D = 2, 8, 32
    x = jax.random.normal(k_x_small, (B, S, D), dtype=jnp.float32)
    w1, b1, w2, b2 = _make_params(k_small, D)
    ref = _reference(x, w1, b1, w2, b2)

    # default path: bf16 matmul inputs, f32 accumulation
    out_bf16 = jax.block_until_ready(feed_forward_block(x, w1, b1, w2, b2))
    assert out_bf16.shape == (B, S, D)
    assert out_bf16.dtype == x.dtype
    assert jnp.allclose(out_bf16, ref, atol=5e-2, rtol=5e-2), "bf16 path mismatch"

    # f32 compute path: tight tolerance vs reference
    out_f32 = jax.block_until_ready(
        feed_forward_block(x, w1, b1, w2, b2, compute_dtype=jnp.float32))
    assert jnp.allclose(out_f32, ref, atol=1e-4, rtol=1e-4), "f32 path mismatch"

    # --- exercise the hidden-dim-split (accumulator) path at D=256 ----------
    D2 = 256
    x2 = jax.random.normal(k_x_big, (B, S, D2), dtype=jnp.float32)
    w1b, b1b, w2b, b2b = _make_params(k_big, D2)
    ref2 = _reference(x2, w1b, b1b, w2b, b2b)
    out_split = jax.block_until_ready(
        feed_forward_block(x2, w1b, b1b, w2b, b2b,
                           compute_dtype=jnp.float32, tk=128))
    assert out_split.shape == (B, S, D2)
    assert jnp.allclose(out_split, ref2, atol=2e-3, rtol=2e-3), "split path mismatch"

    print("KERNEL_OK")
</pallas_src>

<mosaic_0001>
module attributes {stable_mosaic.version = 11 : i64} {
  func.func @_ffn_kernel_resident(%arg0: i32, %arg1: memref<16x32xbf16, #tpu.memory_space<vmem>>, %arg2: memref<32x32xbf16, #tpu.memory_space<vmem>>, %arg3: memref<1x32xf32, #tpu.memory_space<vmem>>, %arg4: memref<32x32xbf16, #tpu.memory_space<vmem>>, %arg5: memref<1x32xf32, #tpu.memory_space<vmem>>, %arg6: memref<16x32xf32, #tpu.memory_space<vmem>>) attributes {dimension_semantics = [#tpu.dimension_semantics<parallel>], iteration_bounds = array<i64: 1>, scalar_prefetch = 0 : i64, scratch_operands = 0 : i64, tpu.core_type = #tpu.core_type<tc>, window_params = [{transform_indices = @transform_0, window_bounds = array<i64: 16, 32>}, {pipeline_mode = #tpu.pipeline_mode<synchronous>, transform_indices = @transform_1, window_bounds = array<i64: 32, 32>}, {pipeline_mode = #tpu.pipeline_mode<synchronous>, transform_indices = @transform_2, window_bounds = array<i64: 1, 32>}, {pipeline_mode = #tpu.pipeline_mode<synchronous>, transform_indices = @transform_3, window_bounds = array<i64: 32, 32>}, {pipeline_mode = #tpu.pipeline_mode<synchronous>, transform_indices = @transform_4, window_bounds = array<i64: 1, 32>}, {transform_indices = @transform_5, window_bounds = array<i64: 16, 32>}]} {
    %c0 = arith.constant 0 : index
    %c0_0 = arith.constant 0 : index
    %0 = vector.load %arg1[%c0, %c0_0] : memref<16x32xbf16, #tpu.memory_space<vmem>>, vector<16x32xbf16>
    %c0_1 = arith.constant 0 : index
    %c0_2 = arith.constant 0 : index
    %1 = vector.load %arg2[%c0_1, %c0_2] : memref<32x32xbf16, #tpu.memory_space<vmem>>, vector<32x32xbf16>
    %cst = arith.constant dense<0.000000e+00> : vector<16x32xf32>
    %2 = tpu.matmul %0, %1, %cst {dimension_numbers = #tpu.dot_dimension_numbers<[1], [0], [0], [1], [0, 0, 1, 1], [], []>} : vector<16x32xbf16>, vector<32x32xbf16>, vector<16x32xf32> -> vector<16x32xf32>
    %c0_3 = arith.constant 0 : index
    %c0_4 = arith.constant 0 : index
    %3 = vector.load %arg3[%c0_3, %c0_4] : memref<1x32xf32, #tpu.memory_space<vmem>>, vector<1x32xf32>
    %4 = vector.broadcast %3 : vector<1x32xf32> to vector<16x32xf32>
    %5 = arith.addf %2, %4 : vector<16x32xf32>
    %cst_5 = arith.constant 5.000000e-01 : f32
    %6 = vector.broadcast %cst_5 : f32 to vector<16x32xf32>
    %7 = arith.mulf %6, %5 : vector<16x32xf32>
    %cst_6 = arith.constant 0.707106769 : f32
    %8 = vector.broadcast %cst_6 : f32 to vector<16x32xf32>
    %9 = arith.mulf %5, %8 : vector<16x32xf32>
    %10 = math.erf %9 : vector<16x32xf32>
    %cst_7 = arith.constant 1.000000e+00 : f32
    %11 = vector.broadcast %cst_7 : f32 to vector<16x32xf32>
    %12 = arith.addf %11, %10 : vector<16x32xf32>
    %13 = arith.mulf %7, %12 : vector<16x32xf32>
    %14 = arith.truncf %13 : vector<16x32xf32> to vector<16x32xbf16>
    %c0_8 = arith.constant 0 : index
    %c0_9 = arith.constant 0 : index
    %15 = vector.load %arg4[%c0_8, %c0_9] : memref<32x32xbf16, #tpu.memory_space<vmem>>, vector<32x32xbf16>
    %cst_10 = arith.constant dense<0.000000e+00> : vector<16x32xf32>
    %16 = tpu.matmul %14, %15, %cst_10 {dimension_numbers = #tpu.dot_dimension_numbers<[1], [0], [0], [1], [0, 0, 1, 1], [], []>} : vector<16x32xbf16>, vector<32x32xbf16>, vector<16x32xf32> -> vector<16x32xf32>
    %c0_11 = arith.constant 0 : index
    %c0_12 = arith.constant 0 : index
    %17 = vector.load %arg5[%c0_11, %c0_12] : memref<1x32xf32, #tpu.memory_space<vmem>>, vector<1x32xf32>
    %18 = vector.broadcast %17 : vector<1x32xf32> to vector<16x32xf32>
    %19 = arith.addf %16, %18 : vector<16x32xf32>
    %c0_13 = arith.constant 0 : index
    %c0_14 = arith.constant 0 : index
    %20 = vector.load %arg6[%c0_13, %c0_14] : memref<16x32xf32, #tpu.memory_space<vmem>>, vector<16x32xf32>
    tpu.vector_store %arg6[%c0_13, %c0_14], %19 {strides = array<i32>} : memref<16x32xf32, #tpu.memory_space<vmem>>, vector<16x32xf32>,
    return
  }
  func.func @transform_0(%arg0: i32) -> (i32, i32) {
    %c0_i32 = arith.constant 0 : i32
    %c0_i32_0 = arith.constant 0 : i32
    return %arg0, %c0_i32 : i32, i32
  }
  func.func @transform_1(%arg0: i32) -> (i32, i32) {
    %c0_i32 = arith.constant 0 : i32
    %c0_i32_0 = arith.constant 0 : i32
    %c0_i32_1 = arith.constant 0 : i32
    return %c0_i32, %c0_i32_0 : i32, i32
  }
  func.func @transform_2(%arg0: i32) -> (i32, i32) {
    %c0_i32 = arith.constant 0 : i32
    %c0_i32_0 = arith.constant 0 : i32
    %c0_i32_1 = arith.constant 0 : i32
    return %c0_i32, %c0_i32_0 : i32, i32
  }
  func.func @transform_3(%arg0: i32) -> (i32, i32) {
    %c0_i32 = arith.constant 0 : i32
    %c0_i32_0 = arith.constant 0 : i32
    %c0_i32_1 = arith.constant 0 : i32
    return %c0_i32, %c0_i32_0 : i32, i32
  }
  func.func @transform_4(%arg0: i32) -> (i32, i32) {
    %c0_i32 = arith.constant 0 : i32
    %c0_i32_0 = arith.constant 0 : i32
    %c0_i32_1 = arith.constant 0 : i32
    return %c0_i32, %c0_i32_0 : i32, i32
  }
  func.func @transform_5(%arg0: i32) -> (i32, i32) {
    %c0_i32 = arith.constant 0 : i32
    %c0_i32_0 = arith.constant 0 : i32
    return %arg0, %c0_i32 : i32, i32
  }
}

</mosaic_0001>

<bundles_post_ra>
// kernel: tpu_custom_call.1
= control target key start
LH: loop header
LB: loop body
LE: loop exit
PB: predicated region body
PF: predicated region fallthrough
CT: control target
= control target key end

     0   :  { %10 = vsyncpa [#allocation3], 0  ;;  %s485_s0 = inlined_call_operand.hbm [shape: bf16[16,32], index: 0, kind: input, shape index: {}]   ;;  %s486_s1 = inlined_call_operand.hbm [shape: bf16[32,32], index: 1, kind: input, shape index: {}]   ;;  %s487_s2 = inlined_call_operand.vmem [shape: f32[1,32], index: 2, kind: input, shape index: {}]   ;;  %s488_s3 = inlined_call_operand.hbm [shape: bf16[32,32], index: 3, kind: input, shape index: {}]   ;;  %s489_s4 = inlined_call_operand.vmem [shape: f32[1,32], index: 4, kind: input, shape index: {}]   ;;  %s490_s5 = inlined_call_operand.hbm [shape: f32[16,32], index: 5, kind: output, shape index: {}]  }
   0x1   :  { %11 = vsyncpa [#allocation6], 0 }
   0x2   :  { %12 = vsyncpa [#allocation4], 0  ;;  %s30_s20 = sshll.u32 %s486_s1, 4  ;;  %s407_s21 = smov [#allocation5]   ;;  %s31_s20 = int_to_ptr.hbm [resolvable:$true] %s30_s20 }
   0x3   :  { %s32_s22 = sshll.u32 %s407_s21, 4  ;;  %s17_s25 = sshll.u32 %s485_s0, 4  ;;  %s33_s22 = int_to_ptr.vmem [resolvable:$true] %s32_s22  ;;  %s18_s25 = int_to_ptr.hbm [resolvable:$true] %s17_s25 }
   0x4   :  { %s408_s26 = smov 64   ;;  %s409_s27 = smov 4  }
   0x5   :  { %38 = dma.hbm_to_vmem [thread:$0]  %s31_s20, 256, %s33_s22, [#allocation6], %s408_s26, %s408_s26, %s409_s27  }
   0x6   :  { %s410_s28 = smov [#allocation2]   ;;  %s45_s7 = sshll.u32 %s488_s3, 4  ;;  %s46_s7 = int_to_ptr.hbm [resolvable:$true] %s45_s7 }
   0x7   :  { %s19_s29 = sshll.u32 %s410_s28, 4  ;;  %s411_s1 = smov [#allocation7]   ;;  %s20_s29 = int_to_ptr.vmem [resolvable:$true] %s19_s29 }
   0x8   :  { %25 = dma.hbm_to_vmem [thread:$0]  %s18_s25, 128, %s20_s29, [#allocation3], %s408_s26, %s408_s26, %s409_s27  }
   0x9   :  { %s47_s8 = sshll.u32 %s411_s1, 4  ;;  %s48_s8 = int_to_ptr.vmem [resolvable:$true] %s47_s8 }
   0xa   :  { %53 = dma.hbm_to_vmem [thread:$0]  %s46_s7, 256, %s48_s8, [#allocation6], %s408_s26, %s408_s26, %s409_s27  }
   0xb   :  { %401 = dma.done.wait [#allocation3], 128  }
   0xc   :  { %402 = vsyncadd [#allocation3], 4294967168 }
   0xd   :  { %403 = dma.done.wait [#allocation6], 512  }
   0xe   :  { %404 = vsyncadd [#allocation6], 4294966784  ;;  %v288_v0 = vld [vmem:[#allocation5 + $0x8] sm:$0xff]  ;;  %v287_v1 = vld [vmem:[#allocation5] sm:$0xff]  ;;  %vm96_vm0 = vcmask 261120   ;;  %s412_s10 = smov [#allocation8]  }
   0xf   :  { %106 = vmatpush.bf16.msra.mxu0 %v288_v0  ;;  %v286_v2 = vld [vmem:[#allocation2] sm:$0xff]  ;;  %v289_v42 = vld [vmem:[#allocation7] sm:$0xff]  ;;  %s246_s11 = sshll.u32 %s412_s10, 4  ;;  %s248_s14 = sshll.u32 %s490_s5, 4  ;;  %s247_s11 = int_to_ptr.vmem [resolvable:$true] %s246_s11  ;;  %s249_s14 = int_to_ptr.hbm [resolvable:$true] %s248_s14 }
  0x10   :  { %v299_v3 = vld [vmem:[%s487_s2] ss:$0 sm:$0xff]  ;;  %s413_s15 = smov 128   ;;  %s414_s16 = smov 8  }
  0x11   :  { %v290_v36 = vld [vmem:[#allocation7 + $0x8] sm:$0xff] }
  0x12   :  { %232 = vmatpush.bf16.msra.mxu1 %v290_v36 }
  0x13   :  { %107 = vmatpush.bf16.msra.mxu0 %v287_v1 }
  0x16   :  { %274 = vmatmul.msk.bf16.vlgmr.msra.gmra.mxu0 %vm96_vm0, %v286_v2  ;;  %233 = vmatpush.bf16.msra.mxu1 %v289_v42 }
  0x93   :  { %v109_v4 = vpop.f32.mrf.mxu0 }
  0x94   :  { %v458_v5 = vadd.f32 %v299_v3, %v109_v4 }
  0x96   :  { %v461_v6 = vmul.f32 0.70710677, %v458_v5 }
  0x98   :  { %v118_v7 = vmul.f32 %v461_v6, %v461_v6 }
  0x9a   :  { %v119_v8 = vmin.f32 %v118_v7, 16.0 }
  0x9b   :  { %v111_v9 = vpop.f32.mrf.mxu0 }
  0x9c   :  { %v120_v10 = vmul.f32 2.1237322e-06, %v119_v8  ;;  %v131_v11 = vmul.f32 3.8918573e-05, %v119_v8  ;;  %v465_v12 = vadd.f32 %v299_v3, %v111_v9 }
  0x9e   :  { %v121_v13 = vadd.f32 0.00028619796, %v120_v10  ;;  %v132_v14 = vadd.f32 0.001143296, %v131_v11  ;;  %v468_v15 = vmul.f32 0.70710677, %v465_v12 }
  0xa0   :  { %v133_v16 = vmul.f32 %v132_v14, %v119_v8  ;;  %v158_v17 = vmul.f32 %v468_v15, %v468_v15  ;;  %v122_v18 = vmul.f32 %v121_v13, %v119_v8 }
  0xa2   :  { %v134_v19 = vadd.f32 0.014752088, %v133_v16  ;;  %v159_v20 = vmin.f32 %v158_v17, 16.0  ;;  %v123_v24 = vadd.f32 0.0036580483, %v122_v18 }
  0xa4   :  { %v135_v21 = vmul.f32 %v134_v19, %v119_v8  ;;  %v160_v22 = vmul.f32 2.1237322e-06, %v159_v20  ;;  %v171_v23 = vmul.f32 3.8918573e-05, %v159_v20  ;;  %v124_v31 = vmul.f32 %v123_v24, %v119_v8 }
  0xa6   :  { %v136_v25 = vadd.f32 0.112945676, %v135_v21  ;;  %v161_v26 = vadd.f32 0.00028619796, %v160_v22  ;;  %v172_v27 = vadd.f32 0.001143296, %v171_v23 }
  0xa7   :  { %v125_v38 = vadd.f32 0.05243302, %v124_v31  ;;  %v114_v22 = vmul.f32 0.5, %v458_v5  ;;  %v115_v23 = vmul.f32 0.5, %v465_v12 }
  0xa8   :  { %v137_v28 = vmul.f32 %v136_v25, %v119_v8  ;;  %v162_v29 = vmul.f32 %v161_v26, %v159_v20  ;;  %v173_v30 = vmul.f32 %v172_v27, %v159_v20 }
  0xa9   :  { %v126_v44 = vmul.f32 %v125_v38, %v119_v8 }
  0xaa   :  { %v138_v32 = vadd.f32 0.4994258, %v137_v28  ;;  %v163_v33 = vadd.f32 0.0036580483, %v162_v29  ;;  %v174_v34 = vadd.f32 0.014752088, %v173_v30 }
  0xab   :  { %v127_v49 = vadd.f32 0.18741608, %v126_v44 }
  0xac   :  { %v139_v35 = vmul.f32 %v138_v32, %v119_v8  ;;  %v175_v37 = vmul.f32 %v174_v34, %v159_v20  ;;  %v164_v40 = vmul.f32 %v163_v33, %v159_v20 }
  0xad   :  { %v128_v54 = vmul.f32 %v127_v49, %v119_v8 }
  0xae   :  { %v140_v39 = vadd.f32 1.0, %v139_v35  ;;  %v176_v41 = vadd.f32 0.112945676, %v175_v37  ;;  %v165_v45 = vadd.f32 0.05243302, %v164_v40 }
  0xaf   :  { %v129_v60 = vadd.f32 1.1283791, %v128_v54 }
  0xb0   :  { %301 = vrcp.f32 %v140_v39  ;;  %v177_v43 = vmul.f32 %v176_v41, %v159_v20  ;;  %v166_v51 = vmul.f32 %v165_v45, %v159_v20  ;;  %v152_v56 = vand.u32 2147483648, %v140_v39 }
  0xb1   :  { %v150_v58 = vand.u32 2147483647, %v140_v39  ;;  %vm146_vm2 = vweird.f32 %v140_v39  ;;  %v130_v3 = vmul.f32 %v129_v60, %v461_v6 }
  0xb2   :  { %v178_v46 = vadd.f32 0.4994258, %v177_v43  ;;  %v167_v57 = vadd.f32 0.18741608, %v166_v51  ;;  %v153_v63 = vor.u32 1.1754944e-38, %v152_v56 }
  0xb3   :  { %vm151_vm4 = vcmp.eq.f32.partialorder %v150_v58, 8.507059e+37 }
  0xb4   :  { %v179_v47 = vmul.f32 %v178_v46, %v159_v20  ;;  %v168_v0 = vmul.f32 %v167_v57, %v159_v20 }
  0xb6   :  { %v302_v48 = vpop.eup %301  ;;  %v180_v52 = vadd.f32 1.0, %v179_v47  ;;  %v169_v7 = vadd.f32 1.1283791, %v168_v0 }
  0xb7   :  { %v142_v50 = vmul.f32 %v302_v48, %v140_v39  ;;  %vm147_vm1 = vweird.f32 %v302_v48 }
  0xb8   :  { %303 = vrcp.f32 %v180_v52  ;;  %vm148_vm3 = vmor %vm146_vm2, %vm147_vm1  ;;  %v192_v8 = vand.u32 2147483648, %v180_v52  ;;  %v190_v11 = vand.u32 2147483647, %v180_v52  ;;  %vm186_vm6 = vweird.f32 %v180_v52 }
  0xb9   :  { %v143_v53 = vsub.f32 1.0, %v142_v50  ;;  %v170_v17 = vmul.f32 %v169_v7, %v468_v15  ;;  %v300_v15 = vld [vmem:[%s489_s4] ss:$0 sm:$0xff] }
  0xba   :  { %v193_v14 = vor.u32 1.1754944e-38, %v192_v8  ;;  %vm191_vm8 = vcmp.eq.f32.partialorder %v190_v11, 8.507059e+37 }
  0xbb   :  { %v144_v55 = vmul.f32 %v302_v48, %v143_v53 }
  0xbd   :  { %v145_v59 = vadd.f32 %v302_v48, %v144_v55 }
  0xbe   :  { %v304_v61 = vpop.eup %303 }
  0xbf   :  { %v149_v62 = vsel %vm148_vm3, %v302_v48, %v145_v59  ;;  %v182_v1 = vmul.f32 %v304_v61, %v180_v52  ;;  %vm187_vm5 = vweird.f32 %v304_v61 }
  0xc0   :  { %v154_v2 = vsel %vm151_vm4, %v153_v63, %v149_v62  ;;  %vm188_vm7 = vmor %vm186_vm6, %vm187_vm5 }
  0xc1   :  { %v183_v4 = vsub.f32 1.0, %v182_v1  ;;  %v155_v9 = vmul.f32 %v154_v2, %v130_v3 }
  0xc3   :  { %v184_v10 = vmul.f32 %v304_v61, %v183_v4  ;;  %v275_v16 = vclamps-f32 %v155_v9, 1.0 }
  0xc5   :  { %v185_v13 = vadd.f32 %v304_v61, %v184_v10  ;;  %v198_v21 = vadd.f32 1.0, %v275_v16 }
  0xc7   :  { %v189_v18 = vsel %vm188_vm7, %v304_v61, %v185_v13  ;;  %v200_v25 = vmul.f32 %v198_v21, %v114_v22 }
  0xc8   :  { %v194_v19 = vsel %vm191_vm8, %v193_v14, %v189_v18 }
  0xc9   :  { %v195_v20 = vmul.f32 %v194_v19, %v170_v17 }
  0xcb   :  { %v276_v6 = vclamps-f32 %v195_v20, 1.0 }
  0xcd   :  { %v199_v24 = vadd.f32 1.0, %v276_v6 }
  0xcf   :  { %v201_v26 = vmul.f32 %v199_v24, %v115_v23 }
  0xd1   :  { %v202_v27 = vpack.c.bf16 %v201_v26, %v200_v25 }
  0xd3   :  { %285 = vmatmul.msk.bf16.vlgmr.msra.gmra.mxu1 %vm96_vm0, %v202_v27 }
 0x150   :  { %v235_v28 = vpop.f32.mrf.mxu1 }
 0x151   :  { %v236_v29 = vadd.f32 %v300_v15, %v235_v28 }
 0x153   :  { %240 = vst.msk [vmem:[#allocation8] sm:$0xff] %vm96_vm0, %v236_v29 }
 0x158   :  { %v237_v5 = vpop.f32.mrf.mxu1 }
 0x159   :  { %v238_v12 = vadd.f32 %v300_v15, %v237_v5 }
 0x15b   :  { %241 = vst.msk [vmem:[#allocation8 + $0x8] sm:$0xff] %vm96_vm0, %v238_v12 }
 0x15c   :  { %254 = dma.vmem_to_hbm [thread:$0]  %s247_s11, 256, %s249_s14, [#allocation4], %s413_s15, %s413_s15, %s414_s16  }
 0x15d   :  { %405 = dma.done.wait [#allocation4], 256  }
 0x15e   :  { %406 = vsyncadd [#allocation4], 4294967040 }
 0x15f   :  { %259 = vsyncpa [#allocation3], 1 }
 0x160   :  { %260 = vsyncpa [#allocation6], 1 }
 0x161   :  { %261 = vsyncpa [#allocation4], 1 }

</bundles_post_ra>
